<compile_context>
chip_gen: v6e
topology: v6e:2x2x1
jax: 0.10.0
libtpu: 0.0.40
codegen_flags: <defaults>
</compile_context>

<pallas_src>
import jax
import jax.numpy as jnp
from jax.experimental import pallas as pl
from jax.experimental.pallas import tpu as pltpu

HIDDEN = 256
LANE = 128            # lane-dense output width (sliced to 1 in the wrapper)
MAX_BATCH_TILE = 256  # upper bound on batch rows per grid step


def _round_up(x, m):
    return ((x + m - 1) // m) * m


def actor_kernel(state_ref, env_ref, w1a_ref, w1b_ref, b1_ref,
                 w2_ref, b2_ref, w4_ref, b4_ref, out_ref):
    """One batch tile of the Actor MLP, fully VMEM-resident.

    state: [TB, S], env: [TB, 3]
    w1a:   [S, H], w1b: [3, H], b1: [1, H]    (fc1; concat fused away)
    w2:    [H, H], b2: [1, H]                 (fc2)
    w4:    [1, H] (row), b4: [1, 1] in SMEM   (fc4; N=1 -> VPU/XLU reduction)
    out:   [TB, LANE] lane-dense; column 0 carries the logit.
    """
    # fc1:  x @ W1 == state @ W1[:S] + env @ W1[S:]
    h1 = (jnp.dot(state_ref[...], w1a_ref[...], preferred_element_type=jnp.float32)
          + jnp.dot(env_ref[...], w1b_ref[...], preferred_element_type=jnp.float32)
          + b1_ref[...])
    h1 = jnp.maximum(h1, 0.0)                                   # ReLU

    # fc2 (the only non-trivial MXU work: [TB,256] x [256,256])
    h2 = jnp.dot(h1, w2_ref[...], preferred_element_type=jnp.float32) + b2_ref[...]
    h2 = jnp.maximum(h2, 0.0)                                   # ReLU

    # fc4: output width 1 -> elementwise mul (VPU) + cross-lane sum (XLU),
    # instead of a lane-sparse [256,1] MXU pass.
    logit = jnp.sum(h2 * w4_ref[...], axis=-1, keepdims=True) + b4_ref[0, 0]

    # Lane-dense unmasked store; wrapper keeps only column 0.
    out_ref[...] = jnp.broadcast_to(logit, out_ref.shape).astype(out_ref.dtype)


def actor_forward(state, env_embed_3d, params):
    """Pallas-backed forward pass of Actor. Returns [B, 1] logits."""
    w1a, w1b, b1, w2, b2, w4, b4 = params
    B, S = state.shape
    E = env_embed_3d.shape[1]
    H = w1a.shape[1]

    # Pick the number of batch tiles first, then the smallest 8-aligned tile
    # that covers B with that many tiles (minimizes padded rows).
    ntiles = max(1, -(-B // MAX_BATCH_TILE))        # ceil(B / MAX_BATCH_TILE)
    TB = _round_up(-(-B // ntiles), 8)              # ceil(B / ntiles) -> mult of 8
    Bp = ntiles * TB
    if Bp != B:
        state = jnp.pad(state, ((0, Bp - B), (0, 0)))
        env_embed_3d = jnp.pad(env_embed_3d, ((0, Bp - B), (0, 0)))

    grid = (ntiles,)

    out = pl.pallas_call(
        actor_kernel,
        out_shape=jax.ShapeDtypeStruct((Bp, LANE), jnp.float32),
        grid_spec=pltpu.PrefetchScalarGridSpec(
            num_scalar_prefetch=0,
            grid=grid,
            in_specs=[
                pl.BlockSpec((TB, S), lambda i: (i, 0)),    # state tile
                pl.BlockSpec((TB, E), lambda i: (i, 0)),    # env tile
                pl.BlockSpec((S, H), lambda i: (0, 0)),     # W1a (VMEM-resident)
                pl.BlockSpec((E, H), lambda i: (0, 0)),     # W1b (VMEM-resident)
                pl.BlockSpec((1, H), lambda i: (0, 0)),     # b1
                pl.BlockSpec((H, H), lambda i: (0, 0)),     # W2  (VMEM-resident)
                pl.BlockSpec((1, H), lambda i: (0, 0)),     # b2
                pl.BlockSpec((1, H), lambda i: (0, 0)),     # W4 row (lane-dense)
                pl.BlockSpec(memory_space=pltpu.MemorySpace.SMEM),  # b4 scalar
            ],
            out_specs=pl.BlockSpec((TB, LANE), lambda i: (i, 0)),
        ),
        compiler_params=pltpu.CompilerParams(
            # batch tiles are independent -> shard across TCs on v7x megacore
            dimension_semantics=("parallel",),
        ),
    )(state, env_embed_3d, w1a, w1b, b1, w2, b2, w4, b4)

    return out[:B, :1]


def init_params(state_dim, key):
    """Deterministic synthetic parameters matching the module's shapes.

    PyTorch stores Linear weight as [out, in]; we pre-transpose to [in, out]
    and split W1 along its input axis (state | env) so the concat is fused.
    fc4's weight is kept as a lane-dense row [1, H].
    """
    input_dim = state_dim + 3
    k1, k2, k3, k4, k5, k6 = jax.random.split(key, 6)

    def uinit(k, shape, fan_in):
        bound = 1.0 / jnp.sqrt(jnp.float32(fan_in))
        return jax.random.uniform(k, shape, jnp.float32, -bound, bound)

    w1 = uinit(k1, (input_dim, HIDDEN), input_dim)
    w1a, w1b = w1[:state_dim], w1[state_dim:]
    b1 = uinit(k2, (1, HIDDEN), input_dim)
    w2 = uinit(k3, (HIDDEN, HIDDEN), HIDDEN)
    b2 = uinit(k4, (1, HIDDEN), HIDDEN)
    w4 = uinit(k5, (1, HIDDEN), HIDDEN)       # fc4 weight as [1, H] row
    b4 = uinit(k6, (1, 1), HIDDEN)
    return (w1a, w1b, b1, w2, b2, w4, b4)


def actor_forward_ref(state, env_embed_3d, params):
    """Pure-JAX reference (uses the original concat formulation)."""
    w1a, w1b, b1, w2, b2, w4, b4 = params
    x = jnp.concatenate([state, env_embed_3d], axis=-1)
    w1 = jnp.concatenate([w1a, w1b], axis=0)
    h1 = jnp.maximum(x @ w1 + b1, 0.0)
    h2 = jnp.maximum(h1 @ w2 + b2, 0.0)
    return h2 @ w4.T + b4


if __name__ == "__main__":
    state_dim = 5            # -> input_dim = state_dim + 3 = 8

    key = jax.random.PRNGKey(0)
    kp, ks1, ke1, ks2, ke2 = jax.random.split(key, 5)
    params = init_params(state_dim, kp)

    fwd = jax.jit(actor_forward)

    # Small batch: single tile, grid=(1,).
    state = jax.random.normal(ks1, (8, state_dim), jnp.float32)
    env = jax.random.normal(ke1, (8, 3), jnp.float32)
    out = jax.block_until_ready(fwd(state, env, params))
    ref = actor_forward_ref(state, env, params)
    assert out.shape == (8, 1)
    assert jnp.allclose(out, ref, atol=2e-5, rtol=2e-5), "mismatch vs reference (B=8)"

    # Larger, non-tile-aligned batch: exercises padding + multi-tile grid.
    state2 = jax.random.normal(ks2, (300, state_dim), jnp.float32)
    env2 = jax.random.normal(ke2, (300, 3), jnp.float32)
    out2 = jax.block_until_ready(fwd(state2, env2, params))
    ref2 = actor_forward_ref(state2, env2, params)
    assert out2.shape == (300, 1)
    assert jnp.allclose(out2, ref2, atol=2e-5, rtol=2e-5), "mismatch vs reference (B=300)"

    print("KERNEL_OK")
</pallas_src>

<mosaic_0001>
module attributes {stable_mosaic.version = 11 : i64} {
  func.func @actor_kernel(%arg0: i32, %arg1: memref<8x5xf32, #tpu.memory_space<vmem>>, %arg2: memref<8x3xf32, #tpu.memory_space<vmem>>, %arg3: memref<5x256xf32, #tpu.memory_space<vmem>>, %arg4: memref<3x256xf32, #tpu.memory_space<vmem>>, %arg5: memref<1x256xf32, #tpu.memory_space<vmem>>, %arg6: memref<256x256xf32, #tpu.memory_space<vmem>>, %arg7: memref<1x256xf32, #tpu.memory_space<vmem>>, %arg8: memref<1x256xf32, #tpu.memory_space<vmem>>, %arg9: memref<1x1xf32, #tpu.memory_space<smem>>, %arg10: memref<8x128xf32, #tpu.memory_space<vmem>>) attributes {dimension_semantics = [#tpu.dimension_semantics<parallel>], iteration_bounds = array<i64: 1>, scalar_prefetch = 0 : i64, scratch_operands = 0 : i64, tpu.core_type = #tpu.core_type<tc>, window_params = [{transform_indices = @transform_0, window_bounds = array<i64: 8, 5>}, {transform_indices = @transform_1, window_bounds = array<i64: 8, 3>}, {pipeline_mode = #tpu.pipeline_mode<synchronous>, transform_indices = @transform_2, window_bounds = array<i64: 5, 256>}, {pipeline_mode = #tpu.pipeline_mode<synchronous>, transform_indices = @transform_3, window_bounds = array<i64: 3, 256>}, {pipeline_mode = #tpu.pipeline_mode<synchronous>, transform_indices = @transform_4, window_bounds = array<i64: 1, 256>}, {pipeline_mode = #tpu.pipeline_mode<synchronous>, transform_indices = @transform_5, window_bounds = array<i64: 256, 256>}, {pipeline_mode = #tpu.pipeline_mode<synchronous>, transform_indices = @transform_6, window_bounds = array<i64: 1, 256>}, {pipeline_mode = #tpu.pipeline_mode<synchronous>, transform_indices = @transform_7, window_bounds = array<i64: 1, 256>}, {transform_indices = @transform_8, window_bounds = array<i64: 1, 1>}, {transform_indices = @transform_9, window_bounds = array<i64: 8, 128>}]} {
    %c0 = arith.constant 0 : index
    %c0_0 = arith.constant 0 : index
    %0 = vector.load %arg1[%c0, %c0_0] : memref<8x5xf32, #tpu.memory_space<vmem>>, vector<8x5xf32>
    %c0_1 = arith.constant 0 : index
    %c0_2 = arith.constant 0 : index
    %1 = vector.load %arg3[%c0_1, %c0_2] : memref<5x256xf32, #tpu.memory_space<vmem>>, vector<5x256xf32>
    %cst = arith.constant dense<0.000000e+00> : vector<8x256xf32>
    %2 = tpu.matmul %0, %1, %cst {dimension_numbers = #tpu.dot_dimension_numbers<[1], [0], [0], [1], [0, 0, 1, 1], [], []>} : vector<8x5xf32>, vector<5x256xf32>, vector<8x256xf32> -> vector<8x256xf32>
    %c0_3 = arith.constant 0 : index
    %c0_4 = arith.constant 0 : index
    %3 = vector.load %arg2[%c0_3, %c0_4] : memref<8x3xf32, #tpu.memory_space<vmem>>, vector<8x3xf32>
    %c0_5 = arith.constant 0 : index
    %c0_6 = arith.constant 0 : index
    %4 = vector.load %arg4[%c0_5, %c0_6] : memref<3x256xf32, #tpu.memory_space<vmem>>, vector<3x256xf32>
    %cst_7 = arith.constant dense<0.000000e+00> : vector<8x256xf32>
    %5 = tpu.matmul %3, %4, %cst_7 {dimension_numbers = #tpu.dot_dimension_numbers<[1], [0], [0], [1], [0, 0, 1, 1], [], []>} : vector<8x3xf32>, vector<3x256xf32>, vector<8x256xf32> -> vector<8x256xf32>
    %6 = arith.addf %2, %5 : vector<8x256xf32>
    %c0_8 = arith.constant 0 : index
    %c0_9 = arith.constant 0 : index
    %7 = vector.load %arg5[%c0_8, %c0_9] : memref<1x256xf32, #tpu.memory_space<vmem>>, vector<1x256xf32>
    %8 = vector.broadcast %7 : vector<1x256xf32> to vector<8x256xf32>
    %9 = arith.addf %6, %8 : vector<8x256xf32>
    %cst_10 = arith.constant 0.000000e+00 : f32
    %10 = vector.broadcast %cst_10 : f32 to vector<8x256xf32>
    %11 = arith.maximumf %9, %10 : vector<8x256xf32>
    %c0_11 = arith.constant 0 : index
    %c0_12 = arith.constant 0 : index
    %12 = vector.load %arg6[%c0_11, %c0_12] : memref<256x256xf32, #tpu.memory_space<vmem>>, vector<256x256xf32>
    %cst_13 = arith.constant dense<0.000000e+00> : vector<8x256xf32>
    %13 = tpu.matmul %11, %12, %cst_13 {dimension_numbers = #tpu.dot_dimension_numbers<[1], [0], [0], [1], [0, 0, 1, 1], [], []>} : vector<8x256xf32>, vector<256x256xf32>, vector<8x256xf32> -> vector<8x256xf32>
    %c0_14 = arith.constant 0 : index
    %c0_15 = arith.constant 0 : index
    %14 = vector.load %arg7[%c0_14, %c0_15] : memref<1x256xf32, #tpu.memory_space<vmem>>, vector<1x256xf32>
    %15 = vector.broadcast %14 : vector<1x256xf32> to vector<8x256xf32>
    %16 = arith.addf %13, %15 : vector<8x256xf32>
    %cst_16 = arith.constant 0.000000e+00 : f32
    %17 = vector.broadcast %cst_16 : f32 to vector<8x256xf32>
    %18 = arith.maximumf %16, %17 : vector<8x256xf32>
    %c0_17 = arith.constant 0 : index
    %c0_18 = arith.constant 0 : index
    %19 = vector.load %arg8[%c0_17, %c0_18] : memref<1x256xf32, #tpu.memory_space<vmem>>, vector<1x256xf32>
    %20 = vector.broadcast %19 : vector<1x256xf32> to vector<8x256xf32>
    %21 = arith.mulf %18, %20 : vector<8x256xf32>
    %cst_19 = arith.constant dense<0.000000e+00> : vector<8xf32>
    %22 = vector.multi_reduction <add>, %21, %cst_19 [1] : vector<8x256xf32> to vector<8xf32>
    %23 = vector.shape_cast %22 : vector<8xf32> to vector<8x1xf32>
    %c0_20 = arith.constant 0 : index
    %c0_21 = arith.constant 0 : index
    %24 = memref.load %arg9[%c0_20, %c0_21] : memref<1x1xf32, #tpu.memory_space<smem>>
    %25 = vector.broadcast %24 : f32 to vector<8x1xf32>
    %26 = arith.addf %23, %25 : vector<8x1xf32>
    %27 = vector.shape_cast %26 : vector<8x1xf32> to vector<8x1xf32>
    %28 = vector.broadcast %27 : vector<8x1xf32> to vector<8x128xf32>
    %c0_22 = arith.constant 0 : index
    %c0_23 = arith.constant 0 : index
    %29 = vector.load %arg10[%c0_22, %c0_23] : memref<8x128xf32, #tpu.memory_space<vmem>>, vector<8x128xf32>
    tpu.vector_store %arg10[%c0_22, %c0_23], %28 {strides = array<i32>} : memref<8x128xf32, #tpu.memory_space<vmem>>, vector<8x128xf32>,
    return
  }
  func.func @transform_0(%arg0: i32) -> (i32, i32) {
    %c0_i32 = arith.constant 0 : i32
    %c0_i32_0 = arith.constant 0 : i32
    return %arg0, %c0_i32 : i32, i32
  }
  func.func @transform_1(%arg0: i32) -> (i32, i32) {
    %c0_i32 = arith.constant 0 : i32
    %c0_i32_0 = arith.constant 0 : i32
    return %arg0, %c0_i32 : i32, i32
  }
  func.func @transform_2(%arg0: i32) -> (i32, i32) {
    %c0_i32 = arith.constant 0 : i32
    %c0_i32_0 = arith.constant 0 : i32
    %c0_i32_1 = arith.constant 0 : i32
    return %c0_i32, %c0_i32_0 : i32, i32
  }
  func.func @transform_3(%arg0: i32) -> (i32, i32) {
    %c0_i32 = arith.constant 0 : i32
    %c0_i32_0 = arith.constant 0 : i32
    %c0_i32_1 = arith.constant 0 : i32
    return %c0_i32, %c0_i32_0 : i32, i32
  }
  func.func @transform_4(%arg0: i32) -> (i32, i32) {
    %c0_i32 = arith.constant 0 : i32
    %c0_i32_0 = arith.constant 0 : i32
    %c0_i32_1 = arith.constant 0 : i32
    return %c0_i32, %c0_i32_0 : i32, i32
  }
  func.func @transform_5(%arg0: i32) -> (i32, i32) {
    %c0_i32 = arith.constant 0 : i32
    %c0_i32_0 = arith.constant 0 : i32
    %c0_i32_1 = arith.constant 0 : i32
    return %c0_i32, %c0_i32_0 : i32, i32
  }
  func.func @transform_6(%arg0: i32) -> (i32, i32) {
    %c0_i32 = arith.constant 0 : i32
    %c0_i32_0 = arith.constant 0 : i32
    %c0_i32_1 = arith.constant 0 : i32
    return %c0_i32, %c0_i32_0 : i32, i32
  }
  func.func @transform_7(%arg0: i32) -> (i32, i32) {
    %c0_i32 = arith.constant 0 : i32
    %c0_i32_0 = arith.constant 0 : i32
    %c0_i32_1 = arith.constant 0 : i32
    return %c0_i32, %c0_i32_0 : i32, i32
  }
  func.func @transform_8(%arg0: i32) -> (i32, i32) {
    %c0_i32 = arith.constant 0 : i32
    %c0_i32_0 = arith.constant 0 : i32
    %c0_i32_1 = arith.constant 0 : i32
    return %c0_i32, %c0_i32_0 : i32, i32
  }
  func.func @transform_9(%arg0: i32) -> (i32, i32) {
    %c0_i32 = arith.constant 0 : i32
    %c0_i32_0 = arith.constant 0 : i32
    return %arg0, %c0_i32 : i32, i32
  }
}

</mosaic_0001>

<bundles_post_ra>
// kernel: actor_forward.1
= control target key start
LH: loop header
LB: loop body
LE: loop exit
PB: predicated region body
PF: predicated region fallthrough
CT: control target
= control target key end

     0   :  { %15 = vsyncpa [#allocation4], 0  ;;  %s597_s0 = inlined_call_operand.hbm [shape: f32[8,5], index: 0, kind: input, shape index: {}]   ;;  %s598_s1 = inlined_call_operand.vmem [shape: f32[8,3], index: 1, kind: input, shape index: {}]   ;;  %s599_s2 = inlined_call_operand.vmem [shape: f32[5,256], index: 2, kind: input, shape index: {}]   ;;  %s600_s3 = inlined_call_operand.hbm [shape: f32[3,256], index: 3, kind: input, shape index: {}]   ;;  %s601_s4 = inlined_call_operand.vmem [shape: f32[1,256], index: 4, kind: input, shape index: {}]   ;;  %s602_s5 = inlined_call_operand.hbm [shape: f32[256,256], index: 5, kind: input, shape index: {}]   ;;  %s603_s6 = inlined_call_operand.vmem [shape: f32[1,256], index: 6, kind: input, shape index: {}]   ;;  %s604_s7 = inlined_call_operand.vmem [shape: f32[1,256], index: 7, kind: input, shape index: {}]   ;;  %s605_s8 = inlined_call_operand.<no memory space> [shape: f32[1,1], index: 8, kind: input, shape index: {}]   ;;  %s606_s9 = inlined_call_operand.vmem [shape: f32[8,128], index: 9, kind: output, shape index: {}]  }
   0x1   :  { %16 = vsyncpa [#allocation6], 0  ;;  %s508_s30 = smov [#allocation5]   ;;  %s509_s11 = smov [#allocation3]  }
   0x2   :  { %s37_s10 = sshll.u32 %s508_s30, 4  ;;  %s23_s12 = sshll.u32 %s509_s11, 4  ;;  %s38_s10 = int_to_ptr.vmem [resolvable:$true] %s37_s10  ;;  %s24_s12 = int_to_ptr.vmem [resolvable:$true] %s23_s12 }
   0x3   :  { %s452_s13 = scalar_lea.vmem %s38_s10, 128  ;;  %p457_p1 = scmp.lt.s32.totalorder %s38_s10, %s38_s10 }
   0x4   :  { %p453_p0 = scmp.ne.s32.totalorder %s38_s10, %s452_s13  ;;  %p458_p2 = scmp.lt.s32.totalorder %s452_s13, %s452_s13 }
   0x6   :  { %p459_p3 = por %p458_p2, %p457_p1 }
   0x8   :  { %p460_p4 = pnand %p459_p3, %p453_p0 }
   0xa   :  { %463 = shalt.err (!%p460_p4)
}
   0xb   :  { %40 = dma.hbm_to_vmem [thread:$0]  %s600_s3, 128, %s38_s10, [#allocation6]  }
   0xc   :  { %s472_s16 = scalar_lea.vmem %s24_s12, 128  ;;  %p477_p6 = scmp.lt.s32.totalorder %s24_s12, %s24_s12 }
   0xd   :  { %p473_p5 = scmp.ne.s32.totalorder %s24_s12, %s472_s16  ;;  %p478_p7 = scmp.lt.s32.totalorder %s472_s16, %s472_s16 }
   0xf   :  { %p479_p8 = por %p478_p7, %p477_p6 }
  0x11   :  { %p480_p9 = pnand %p479_p8, %p473_p5 }
  0x13   :  { %483 = shalt.err (!%p480_p9)
}
  0x14   :  { %26 = dma.hbm_to_vmem [thread:$0]  %s597_s0, 128, %s24_s12, [#allocation4]  }
  0x15   :  { %s510_s19 = smov [#allocation7]  }
  0x16   :  { %s48_s20 = sshll.u32 %s510_s19, 4  ;;  %s49_s20 = int_to_ptr.vmem [resolvable:$true] %s48_s20 }
  0x17   :  { %s492_s21 = scalar_lea.vmem %s49_s20, 8192  ;;  %p497_p11 = scmp.lt.s32.totalorder %s49_s20, %s49_s20 }
  0x18   :  { %p493_p10 = scmp.ne.s32.totalorder %s49_s20, %s492_s21  ;;  %p498_p12 = scmp.lt.s32.totalorder %s492_s21, %s492_s21 }
  0x1a   :  { %p499_p13 = por %p498_p12, %p497_p11 }
  0x1c   :  { %p500_p0 = pnand %p499_p13, %p493_p10 }
  0x1e   :  { %503 = shalt.err (!%p500_p0)
}
  0x1f   :  { %s511_s3 = smov 256   ;;  %s512_s22 = smov 16  }
  0x20   :  { %54 = dma.hbm_to_vmem [thread:$0]  %s602_s5, 8192, %s49_s20, [#allocation6], %s511_s3, %s511_s3, %s512_s22  }
  0x21   :  { %504 = dma.done.wait [#allocation4], 128  }
  0x22   :  { %505 = vsyncadd [#allocation4], 4294967168 }
  0x23   :  { %506 = dma.done.wait [#allocation6], 8320  }
  0x24   :  { %507 = vsyncadd [#allocation6], 4294958976  ;;  %v513_v0 = vmov 0.0   ;;  %v74_v1 = vld [vmem:[#allocation5] sm:$0x77]  ;;  %vm81_vm0 = vcmask 1042432  }
  0x25   :  { %150 = vmatprep.mubr.f32.mxu1 %v513_v0  ;;  %v76_v2 = vcombine.high %v74_v1, %v74_v1  ;;  %v73_v3 = vld [vmem:[%s598_s1] sm:$0xff]  ;;  %v286_v4 = vld [vmem:[#allocation7 + $0xf8] sm:$0xff]  ;;  %vm77_vm1 = vcmask 23552   ;;  %vm161_vm2 = vcmask 1044480   ;;  %v284_v7 = vld [vmem:[#allocation7 + $0xe8] sm:$0xff]  ;;  %vm157_vm3 = vcmask 39936  }
  0x26   :  { %v72_v5 = vld [vmem:[%s599_s2 + $0x8] sm:$0x1f]  ;;  %331 = vmatprep.subr.mxu0 %v286_v4  ;;  %v285_v6 = vld [vmem:[#allocation7 + $0xf0] sm:$0xff]  ;;  %v283_v9 = vld [vmem:[#allocation7 + $0xe0] sm:$0xff] }
  0x27   :  { %431 = vmatprep.subr.msk.mxu1 %vm81_vm0, %v76_v2  ;;  %v71_v8 = vld [vmem:[%s599_s2] sm:$0x1f]  ;;  %332 = vmatpush1.msra.mxu0 %v285_v6  ;;  %v282_v10 = vld [vmem:[#allocation7 + $0xd8] sm:$0xff]  ;;  %v280_v13 = vld [vmem:[#allocation7 + $0xc8] sm:$0xff] }
  0x28   :  { %432 = vmatpush1.msk.msra.mxu1 %vm81_vm0, %v74_v1  ;;  %333 = vmatprep.subr.mxu0 %v284_v7  ;;  %v70_v11 = vld [vmem:[#allocation3] sm:$0xff]  ;;  %v279_v14 = vld [vmem:[#allocation7 + $0xc0] sm:$0xff]  ;;  %v278_v15 = vld [vmem:[#allocation7 + $0xb8] sm:$0xff]  ;;  %v241_v7 = vlaneseq }
  0x29   :  { %433 = vmatmul.mubr.msk.f32.vlgmr.msra.gmra.mxu1 %vm77_vm1, %v73_v3  ;;  %434 = vmatprep.subr.msk.mxu1 %vm161_vm2, %v72_v5  ;;  %v281_v12 = vld [vmem:[#allocation7 + $0xd0] sm:$0xff]  ;;  %v276_v17 = vld [vmem:[#allocation7 + $0xa8] sm:$0xff]  ;;  %v275_v18 = vld [vmem:[#allocation7 + $0xa0] sm:$0xff] }
  0x2a   :  { %435 = vmatpush1.msk.msra.mxu1 %vm161_vm2, %v71_v8  ;;  %232 = vmatprep.mubr.f32.mxu1 %v513_v0  ;;  %v277_v16 = vld [vmem:[#allocation7 + $0xb0] sm:$0xff]  ;;  %v274_v19 = vld [vmem:[#allocation7 + $0x98] sm:$0xff]  ;;  %v272_v21 = vld [vmem:[#allocation7 + $0x88] sm:$0xff]  ;;  %v242_v8 = vshrl.u32 %v241_v7, 7 }
  0x2b   :  { %334 = vmatpush1.msra.mxu0 %v283_v9  ;;  %v273_v20 = vld [vmem:[#allocation7 + $0x90] sm:$0xff]  ;;  %v271_v22 = vld [vmem:[#allocation7 + $0x80] sm:$0xff]  ;;  %v270_v23 = vld [vmem:[#allocation7 + $0x78] sm:$0xff] }
  0x2c   :  { %335 = vmatprep.subr.mxu0 %v282_v10  ;;  %v269_v24 = vld [vmem:[#allocation7 + $0x70] sm:$0xff]  ;;  %v268_v25 = vld [vmem:[#allocation7 + $0x68] sm:$0xff]  ;;  %v267_v26 = vld [vmem:[#allocation7 + $0x60] sm:$0xff]  ;;  %v243_v10 = vsub.s32 0, %v242_v8 }
  0x2d   :  { %436 = vmatmul.mubr.msk.f32.vlgmr.msra.gmra.mxu1 %vm157_vm3, %v70_v11  ;;  %336 = vmatpush1.msra.mxu0 %v281_v12  ;;  %v266_v27 = vld [vmem:[#allocation7 + $0x58] sm:$0xff]  ;;  %v265_v28 = vld [vmem:[#allocation7 + $0x50] sm:$0xff]  ;;  %v264_v29 = vld [vmem:[#allocation7 + $0x48] sm:$0xff]  ;;  %v247_v12 = vsub.s32 1, %v242_v8 }
  0x2e   :  { %337 = vmatprep.subr.mxu0 %v280_v13  ;;  %v263_v30 = vld [vmem:[#allocation7 + $0x40] sm:$0xff]  ;;  %v262_v31 = vld [vmem:[#allocation7 + $0x38] sm:$0xff]  ;;  %v261_v32 = vld [vmem:[#allocation7 + $0x30] sm:$0xff] }
  0x2f   :  { %338 = vmatpush1.msra.mxu0 %v279_v14  ;;  %v260_v33 = vld [vmem:[#allocation7 + $0x28] sm:$0xff]  ;;  %v259_v34 = vld [vmem:[#allocation7 + $0x20] sm:$0xff]  ;;  %v258_v35 = vld [vmem:[#allocation7 + $0x18] sm:$0xff] }
  0x30   :  { %339 = vmatprep.subr.mxu0 %v278_v15  ;;  %v257_v36 = vld [vmem:[#allocation7 + $0x10] sm:$0xff]  ;;  %v256_v37 = vld [vmem:[#allocation7 + $0x8] sm:$0xff]  ;;  %v255_v38 = vld [vmem:[#allocation7] sm:$0xff] }
  0x31   :  { %340 = vmatpush1.msra.mxu0 %v277_v16  ;;  %v318_v39 = vld [vmem:[#allocation7 + $0x1f8] sm:$0xff]  ;;  %v317_v40 = vld [vmem:[#allocation7 + $0x1f0] sm:$0xff]  ;;  %v316_v41 = vld [vmem:[#allocation7 + $0x1e8] sm:$0xff] }
  0x32   :  { %341 = vmatprep.subr.mxu0 %v276_v17  ;;  %v315_v42 = vld [vmem:[#allocation7 + $0x1e0] sm:$0xff]  ;;  %v314_v43 = vld [vmem:[#allocation7 + $0x1d8] sm:$0xff]  ;;  %v313_v44 = vld [vmem:[#allocation7 + $0x1d0] sm:$0xff] }
  0x33   :  { %342 = vmatpush1.msra.mxu0 %v275_v18  ;;  %v312_v45 = vld [vmem:[#allocation7 + $0x1c8] sm:$0xff]  ;;  %v311_v46 = vld [vmem:[#allocation7 + $0x1c0] sm:$0xff]  ;;  %v310_v47 = vld [vmem:[#allocation7 + $0x1b8] sm:$0xff] }
  0x34   :  { %343 = vmatprep.subr.mxu0 %v274_v19  ;;  %v309_v48 = vld [vmem:[#allocation7 + $0x1b0] sm:$0xff]  ;;  %v308_v49 = vld [vmem:[#allocation7 + $0x1a8] sm:$0xff]  ;;  %v307_v50 = vld [vmem:[#allocation7 + $0x1a0] sm:$0xff] }
  0x35   :  { %344 = vmatpush1.msra.mxu0 %v273_v20  ;;  %v306_v51 = vld [vmem:[#allocation7 + $0x198] sm:$0xff]  ;;  %v305_v52 = vld [vmem:[#allocation7 + $0x190] sm:$0xff]  ;;  %v304_v53 = vld [vmem:[#allocation7 + $0x188] sm:$0xff] }
  0x36   :  { %345 = vmatprep.subr.mxu0 %v272_v21  ;;  %v303_v54 = vld [vmem:[#allocation7 + $0x180] sm:$0xff]  ;;  %v302_v55 = vld [vmem:[#allocation7 + $0x178] sm:$0xff]  ;;  %v301_v56 = vld [vmem:[#allocation7 + $0x170] sm:$0xff] }
  0x37   :  { %346 = vmatpush1.msra.mxu0 %v271_v22  ;;  %v300_v57 = vld [vmem:[#allocation7 + $0x168] sm:$0xff]  ;;  %v299_v58 = vld [vmem:[#allocation7 + $0x160] sm:$0xff]  ;;  %v298_v59 = vld [vmem:[#allocation7 + $0x158] sm:$0xff] }
  0x38   :  { %347 = vmatprep.subr.mxu0 %v270_v23  ;;  %v297_v60 = vld [vmem:[#allocation7 + $0x150] sm:$0xff]  ;;  %v296_v61 = vld [vmem:[#allocation7 + $0x148] sm:$0xff]  ;;  %v295_v62 = vld [vmem:[#allocation7 + $0x140] sm:$0xff] }
  0x39   :  { %348 = vmatpush1.msra.mxu0 %v269_v24  ;;  %v294_v63 = vld [vmem:[#allocation7 + $0x138] sm:$0xff]  ;;  %v293_v0 = vld [vmem:[#allocation7 + $0x130] sm:$0xff]  ;;  %v292_v1 = vld [vmem:[#allocation7 + $0x128] sm:$0xff] }
  0x3a   :  { %349 = vmatprep.subr.mxu0 %v268_v25  ;;  %v291_v2 = vld [vmem:[#allocation7 + $0x120] sm:$0xff]  ;;  %v290_v3 = vld [vmem:[#allocation7 + $0x118] sm:$0xff]  ;;  %v289_v4 = vld [vmem:[#allocation7 + $0x110] sm:$0xff] }
  0x3b   :  { %350 = vmatpush1.msra.mxu0 %v267_v26  ;;  %v288_v5 = vld [vmem:[#allocation7 + $0x108] sm:$0xff]  ;;  %v287_v6 = vld [vmem:[#allocation7 + $0x100] sm:$0xff]  ;;  %v239_v11 = vld [vmem:[%s601_s4] sm:$0x3] }
  0x3c   :  { %351 = vmatprep.subr.mxu0 %v266_v27  ;;  %v244_v15 = vrot.slane %v239_v11, %v243_v10  ;;  %v248_v17 = vrot.slane %v239_v11, %v247_v12  ;;  %v319_v24 = vld [vmem:[%s603_s6] sm:$0x3] }
  0x3d   :  { %352 = vmatpush1.msra.mxu0 %v265_v28  ;;  %v324_v25 = vrot.slane %v319_v24, %v243_v10  ;;  %v328_v26 = vrot.slane %v319_v24, %v247_v12  ;;  %v404_v28 = vld [vmem:[%s604_s7] sm:$0x3] }
  0x3e   :  { %353 = vmatprep.subr.mxu0 %v264_v29 }
  0x3f   :  { %354 = vmatpush1.msra.mxu0 %v263_v30 }
  0x40   :  { %355 = vmatprep.subr.mxu0 %v262_v31 }
  0x41   :  { %356 = vmatpush1.msra.mxu0 %v261_v32 }
  0x42   :  { %357 = vmatprep.subr.mxu0 %v260_v33  ;;  %v409_v33 = vrot.slane %v404_v28, %v243_v10 }
  0x43   :  { %358 = vmatpush1.msra.mxu0 %v259_v34  ;;  %v413_v34 = vrot.slane %v404_v28, %v247_v12 }
  0x44   :  { %359 = vmatprep.subr.mxu0 %v258_v35 }
  0x45   :  { %360 = vmatpush1.msra.mxu0 %v257_v36 }
  0x46   :  { %361 = vmatprep.subr.mxu0 %v256_v37 }
  0x47   :  { %362 = vmatpush1.msra.mxu0 %v255_v38 }
  0x48   :  { %363 = vmatprep.subr.mxu0 %v318_v39  ;;  %v422_v39 = vstv %s605_s8 }
  0x49   :  { %364 = vmatpush2.msra.mxu0 %v317_v40 }
  0x4a   :  { %365 = vmatprep.subr.mxu0 %v316_v41 }
  0x4b   :  { %366 = vmatpush2.msra.mxu0 %v315_v42 }
  0x4c   :  { %367 = vmatprep.subr.mxu0 %v314_v43 }
  0x4d   :  { %368 = vmatpush2.msra.mxu0 %v313_v44 }
  0x4e   :  { %369 = vmatprep.subr.mxu0 %v312_v45 }
  0x4f   :  { %370 = vmatpush2.msra.mxu0 %v311_v46 }
  0x50   :  { %371 = vmatprep.subr.mxu0 %v310_v47 }
  0x51   :  { %372 = vmatpush2.msra.mxu0 %v309_v48 }
  0x52   :  { %373 = vmatprep.subr.mxu0 %v308_v49 }
  0x53   :  { %374 = vmatpush2.msra.mxu0 %v307_v50 }
  0x54   :  { %375 = vmatprep.subr.mxu0 %v306_v51 }
  0x55   :  { %376 = vmatpush2.msra.mxu0 %v305_v52 }
  0x56   :  { %377 = vmatprep.subr.mxu0 %v304_v53 }
  0x57   :  { %378 = vmatpush2.msra.mxu0 %v303_v54 }
  0x58   :  { %379 = vmatprep.subr.mxu0 %v302_v55 }
  0x59   :  { %380 = vmatpush2.msra.mxu0 %v301_v56 }
  0x5a   :  { %381 = vmatprep.subr.mxu0 %v300_v57 }
  0x5b   :  { %382 = vmatpush2.msra.mxu0 %v299_v58 }
  0x5c   :  { %383 = vmatprep.subr.mxu0 %v298_v59 }
  0x5d   :  { %384 = vmatpush2.msra.mxu0 %v297_v60 }
  0x5e   :  { %385 = vmatprep.subr.mxu0 %v296_v61 }
  0x5f   :  { %386 = vmatpush2.msra.mxu0 %v295_v62 }
  0x60   :  { %387 = vmatprep.subr.mxu0 %v294_v63 }
  0x61   :  { %388 = vmatpush2.msra.mxu0 %v293_v0 }
  0x62   :  { %389 = vmatprep.subr.mxu0 %v292_v1 }
  0x63   :  { %390 = vmatpush2.msra.mxu0 %v291_v2 }
  0x64   :  { %391 = vmatprep.subr.mxu0 %v290_v3 }
  0x65   :  { %392 = vmatpush2.msra.mxu0 %v289_v4 }
  0x66   :  { %393 = vmatprep.subr.mxu0 %v288_v5 }
  0x67   :  { %394 = vmatpush2.msra.mxu0 %v287_v6 }
  0xe9   :  { %v152_v9 = vpop.f32.mrf.mxu1 }
  0xeb   :  { %v154_v13 = vpop.f32.mrf.mxu1 }
  0xed   :  { %v234_v14 = vpop.f32.mrf.mxu1 }
  0xee   :  { %v235_v16 = vadd.f32 %v234_v14, %v152_v9 }
  0xef   :  { %v236_v18 = vpop.f32.mrf.mxu1 }
  0xf0   :  { %v237_v19 = vadd.f32 %v236_v18, %v154_v13  ;;  %v251_v20 = vadd.f32 %v244_v15, %v235_v16 }
  0xf2   :  { %v252_v21 = vadd.f32 %v248_v17, %v237_v19  ;;  %v253_v23 = vmax.f32 %v251_v20, 0.0 }
  0xf4   :  { %v254_v22 = vmax.f32 %v252_v21, 0.0 }
  0xf6   :  { %395 = vmatprep.mubr.f32.mxu0 %v254_v22 }
  0xf7   :  { %396 = vmatmul.mubr.f32.vlgmr.msra.gmra.mxu0 %v253_v23 }
 0x1b7   :  { %v397_v27 = vpop.f32.mrf.mxu0 }
 0x1b8   :  { %v398_v29 = vadd.f32 %v397_v27, %v324_v25 }
 0x1b9   :  { %v399_v30 = vpop.f32.mrf.mxu0 }
 0x1ba   :  { %v402_v31 = vmax.f32 %v398_v29, 0.0  ;;  %v400_v32 = vadd.f32 %v399_v30, %v328_v26 }
 0x1bc   :  { %v403_v35 = vmax.f32 %v400_v32, 0.0  ;;  %v416_v36 = vmul.f32 %v409_v33, %v402_v31 }
 0x1be   :  { %v417_v37 = vmul.f32 %v413_v34, %v403_v35 }
 0x1c0   :  { %v418_v38 = vadd.f32 %v417_v37, %v416_v36 }
 0x1c2   :  { %419 = vadd.xlane.f32.xlu0 %v418_v38 }
 0x24b   :  { %v420_v40 = vpop.xlane.xlu0 %419 }
 0x24c   :  { %v423_v41 = vadd.f32 %v422_v39, %v420_v40 }
 0x24e   :  { %424 = vst [vmem:[%s606_s9] sm:$0xff] %v423_v41 }
 0x24f   :  { %429 = vsyncpa [#allocation4], 1 }
 0x250   :  { %430 = vsyncpa [#allocation6], 1 }

</bundles_post_ra>
